<compile_context>
chip_gen: v7x
topology: tpu7x:2x2x1
jax: 0.10.0
libtpu: 0.0.40
codegen_flags: <defaults>
</compile_context>

<pallas_src>
import functools

import jax
import jax.numpy as jnp
from jax import lax
from jax.experimental import pallas as pl
from jax.experimental.pallas import tpu as pltpu


@functools.lru_cache(maxsize=None)
def _vmem_limit_bytes():
    # v5e/v6e: 128 MiB physical -> use up to ~96 MiB.  v7x: 64 MiB -> ~48 MiB.
    try:
        cap = pltpu.get_tpu_info().vmem_capacity_bytes
        return int(min(cap * 3 // 4, 96 * 1024 * 1024))
    except Exception:  # noqa: BLE001  (fallback budget safe on every gen)
        return 48 * 1024 * 1024


# ---------------------------------------------------------------------------
# Kernel 1: fused QKV projection (one wide MXU matmul, batch folded into rows)
# ---------------------------------------------------------------------------
def _qkv_proj_kernel(x_ref, w_ref, q_ref, k_ref, v_ref):
    # x_ref: (tm, C)   row tile of the flattened (B*T, C) input (f32)
    # w_ref: (C, 3C)   packed bf16 [Wq*scale | Wk | Wv], heads along columns
    # q/k/v_ref: (tm, C) bf16 lane-dense outputs (heads in column slices)
    C = q_ref.shape[-1]
    x = x_ref[...].astype(w_ref.dtype)               # bf16 operands,
    qkv = jnp.dot(x, w_ref[...],                     # f32 accumulation
                  preferred_element_type=jnp.float32)  # (tm, 3C)
    q_ref[...] = qkv[:, :C].astype(q_ref.dtype)
    k_ref[...] = qkv[:, C:2 * C].astype(k_ref.dtype)
    v_ref[...] = qkv[:, 2 * C:].astype(v_ref.dtype)


def _qkv_projection(x_flat, w_qkv, *, tm):
    BT, C = x_flat.shape
    out = jax.ShapeDtypeStruct((BT, C), jnp.bfloat16)
    return pl.pallas_call(
        _qkv_proj_kernel,
        out_shape=(out, out, out),
        grid=(BT // tm,),
        in_specs=[
            pl.BlockSpec((tm, C), lambda i: (i, 0)),
            pl.BlockSpec((C, 3 * C), lambda i: (0, 0)),
        ],
        out_specs=[
            pl.BlockSpec((tm, C), lambda i: (i, 0)),
            pl.BlockSpec((tm, C), lambda i: (i, 0)),
            pl.BlockSpec((tm, C), lambda i: (i, 0)),
        ],
        compiler_params=pltpu.CompilerParams(
            dimension_semantics=("parallel",),
            vmem_limit_bytes=_vmem_limit_bytes()),
    )(x_flat, w_qkv)


# ---------------------------------------------------------------------------
# Kernel 2: flash attention (online softmax over kv tiles) + output projection
# ---------------------------------------------------------------------------
def _flash_attn_proj_kernel(q_ref, k_ref, v_ref, wp_ref, bp_ref, o_ref,
                            m_scr, l_scr, acc_scr, *, heads, head_size):
    # q_ref: (1, H, tq, S)  current (batch, q-tile) block, Q pre-scaled, bf16
    # k_ref/v_ref: (1, H, tk, S) current kv tile, bf16
    # wp_ref: (H, S, C) bf16, bp_ref: (1, C) f32
    # o_ref: (1, tq, C)  written once per (b, q-tile) at the last kv step
    # m/l scratch: (H, tq, 1) running max / denominator
    # acc scratch: (H, tq, S) running numerator
    H, S = heads, head_size
    C = H * S
    qi = pl.program_id(1)
    ki = pl.program_id(2)
    nk = pl.num_programs(2)
    tq = q_ref.shape[2]
    tk = k_ref.shape[2]

    NEG = jnp.float32(-1e30)  # finite mask value -> exp underflows to exactly 0

    @pl.when(ki == 0)
    def _init():
        m_scr[...] = jnp.full_like(m_scr, NEG)
        l_scr[...] = jnp.zeros_like(l_scr)
        acc_scr[...] = jnp.zeros_like(acc_scr)

    row_min = qi * tq
    row_max = (qi + 1) * tq - 1
    col_min = ki * tk
    col_max = (ki + 1) * tk - 1

    def _step(apply_mask):
        q = q_ref[0]                                            # (H, tq, S)
        k = k_ref[0]                                            # (H, tk, S)
        v = v_ref[0]                                            # (H, tk, S)

        # Batched-over-heads scores; bf16 operands, f32 accumulation.
        s = jnp.einsum('hqd,hkd->hqk', q, k,
                       preferred_element_type=jnp.float32)      # (H, tq, tk)
        if apply_mask:
            # Only diagonal-straddling blocks pay for the mask construction.
            row = row_min + lax.broadcasted_iota(jnp.int32, (tq, tk), 0)
            col = col_min + lax.broadcasted_iota(jnp.int32, (tq, tk), 1)
            s = jnp.where((col <= row)[None, :, :], s, NEG)

        m_prev = m_scr[...]                                     # (H, tq, 1)
        l_prev = l_scr[...]                                     # (H, tq, 1)
        m_new = jnp.maximum(m_prev, jnp.max(s, axis=-1, keepdims=True))
        alpha = jnp.exp(m_prev - m_new)                         # (H, tq, 1)
        p = jnp.exp(s - m_new)                                  # (H, tq, tk) f32

        m_scr[...] = m_new
        l_scr[...] = alpha * l_prev + jnp.sum(p, axis=-1, keepdims=True)
        # Single full-width accumulate (no per-head masked partial stores).
        acc_scr[...] = alpha * acc_scr[...] + jnp.einsum(
            'hqk,hkd->hqd', p.astype(v.dtype), v,
            preferred_element_type=jnp.float32)                 # (H, tq, S)

    # Block fully below the diagonal: no masking needed.
    @pl.when(col_max <= row_min)
    def _interior():
        _step(apply_mask=False)

    # Block straddling the diagonal: masked path. Blocks fully above the
    # diagonal hit neither branch (their K/V DMA is also clamped away).
    @pl.when(jnp.logical_and(col_min <= row_max, col_max > row_min))
    def _diag():
        _step(apply_mask=True)

    @pl.when(ki == nk - 1)
    def _finalize():
        # Softmax denominator via EUP reciprocal; one full-width normalize.
        inv_l = pl.reciprocal(l_scr[...], approx=True)          # (H, tq, 1)
        normed = (acc_scr[...] * inv_l).astype(wp_ref.dtype)    # (H, tq, S)
        # Output projection accumulated per head (runs once per q-tile only;
        # avoids a rank-3 relayout of the accumulator in the epilogue).
        acc = jnp.zeros((tq, C), jnp.float32)
        for h in range(H):
            acc = acc + jnp.dot(normed[h], wp_ref[h],
                                preferred_element_type=jnp.float32)
        out = acc + bp_ref[...]
        o_ref[0] = out.astype(o_ref.dtype)                      # one wide store


def _flash_attention_proj(q, k, v, wp3, bp, *, tq, tk, out_dtype):
    B, H, T, S = q.shape
    C = H * S
    kernel = functools.partial(_flash_attn_proj_kernel, heads=H, head_size=S)

    # Clamp the kv block index at the causal diagonal so blocks whose compute
    # is skipped are not fetched either (Pallas skips the DMA when the block
    # index does not change between consecutive steps).
    def kv_map(b, i, j):
        return (b, 0, jnp.minimum(j, ((i + 1) * tq - 1) // tk), 0)

    return pl.pallas_call(
        kernel,
        out_shape=jax.ShapeDtypeStruct((B, T, C), out_dtype),
        grid=(B, T // tq, T // tk),
        in_specs=[
            pl.BlockSpec((1, H, tq, S), lambda b, i, j: (b, 0, i, 0)),
            pl.BlockSpec((1, H, tk, S), kv_map),
            pl.BlockSpec((1, H, tk, S), kv_map),
            pl.BlockSpec((H, S, C), lambda b, i, j: (0, 0, 0)),
            pl.BlockSpec((1, C), lambda b, i, j: (0, 0)),
        ],
        out_specs=pl.BlockSpec((1, tq, C), lambda b, i, j: (b, i, 0)),
        scratch_shapes=[
            pltpu.VMEM((H, tq, 1), jnp.float32),   # running max  m
            pltpu.VMEM((H, tq, 1), jnp.float32),   # running sum  l
            pltpu.VMEM((H, tq, S), jnp.float32),   # running acc
        ],
        compiler_params=pltpu.CompilerParams(
            dimension_semantics=("parallel", "parallel", "arbitrary"),
            vmem_limit_bytes=_vmem_limit_bytes()),
    )(q, k, v, wp3, bp)


# ---------------------------------------------------------------------------
# Public wrapper
# ---------------------------------------------------------------------------
def multi_head_attention(x, wq, wk, wv, wp, bp):
    """x: (B, T, C); wq/wk/wv: (H, C, S); wp: (C, C) [in->out]; bp: (1, C)."""
    B, T, C = x.shape
    H, _, S = wq.shape
    assert H * S == C, "heads_num * head_size must equal embd_size"

    # Pack per-head weights into lane-contiguous (C, C) blocks (head h lives in
    # columns [h*S:(h+1)*S]) and fold the module's C**-0.5 score scale into the
    # Q weights (zero in-kernel cost).  Weight repacking is trace-time plumbing.
    scale = float(C) ** -0.5
    wq_p = jnp.transpose(wq, (1, 0, 2)).reshape(C, C) * jnp.float32(scale)
    wk_p = jnp.transpose(wk, (1, 0, 2)).reshape(C, C)
    wv_p = jnp.transpose(wv, (1, 0, 2)).reshape(C, C)
    w_qkv = jnp.concatenate([wq_p, wk_p, wv_p], axis=1).astype(jnp.bfloat16)

    # QKV projection: fold batch into rows -> one wide MXU GEMM, bf16 outputs.
    BT = B * T
    tm = min(BT, 512)
    assert BT % tm == 0 and (tm % 16 == 0 or tm == BT), \
        "B*T must tile into bf16-friendly row tiles"
    qf, kf, vf = _qkv_projection(x.reshape(BT, C), w_qkv, tm=tm)

    # Head-leading layout (B, H, T, S) for the batched flash kernel.  This is
    # pure wrapper-side layout plumbing on bf16 data (done once; K/V would be
    # re-read T/tq times by the flash kernel otherwise).
    def to_heads(a):
        return a.reshape(B, T, H, S).transpose(0, 2, 1, 3)

    q = to_heads(qf)
    k = to_heads(kf)
    v = to_heads(vf)

    # Flash tiling: q tiles parallel, kv tiles are the (last, arbitrary)
    # reduction axis.  256-wide tiles amortize per-step overhead while staying
    # inside the per-chip VMEM budget.
    tq = min(T, 256)
    tk = min(T, 256)
    assert T % tq == 0 and T % tk == 0
    assert (tq % 16 == 0 or tq == T) and (tk % 16 == 0 or tk == T)

    wp3 = wp.astype(jnp.bfloat16).reshape(H, S, C)   # per-head row blocks of Wp
    return _flash_attention_proj(q, k, v, wp3, bp,
                                 tq=tq, tk=tk, out_dtype=x.dtype)


# ---------------------------------------------------------------------------
# Pure-JAX reference mirroring the PyTorch forward (eval mode)
# ---------------------------------------------------------------------------
def _reference(x, wq, wk, wv, wp, bp):
    B, T, C = x.shape
    q = jnp.einsum('btc,hcs->bhts', x, wq)
    k = jnp.einsum('btc,hcs->bhts', x, wk)
    v = jnp.einsum('btc,hcs->bhts', x, wv)
    scores = jnp.einsum('bhts,bhus->bhtu', q, k) * (C ** -0.5)
    mask = jnp.tril(jnp.ones((T, T), dtype=bool))
    scores = jnp.where(mask[None, None], scores, -jnp.inf)
    wei = jax.nn.softmax(scores, axis=-1)
    out_h = jnp.einsum('bhtu,bhus->bhts', wei, v)
    cat = jnp.transpose(out_h, (0, 2, 1, 3)).reshape(B, T, C)
    return cat @ wp + bp


if __name__ == "__main__":
    # Small deterministic config.
    B, T = 2, 8                         # batch, sequence length (== block_size)
    heads_num, head_size = 4, 8
    embd_size = heads_num * head_size   # 32

    key = jax.random.PRNGKey(0)
    kx, kq, kk, kv, kp, kb = jax.random.split(key, 6)

    x = jax.random.normal(kx, (B, T, embd_size), dtype=jnp.float32)
    # Per-head weights stacked as (H, C, S); projection weight stored in->out.
    wq = jax.random.normal(kq, (heads_num, embd_size, head_size), jnp.float32) * 0.1
    wk = jax.random.normal(kk, (heads_num, embd_size, head_size), jnp.float32) * 0.1
    wv = jax.random.normal(kv, (heads_num, embd_size, head_size), jnp.float32) * 0.1
    wp = jax.random.normal(kp, (embd_size, embd_size), jnp.float32) * 0.1
    bp = jax.random.normal(kb, (1, embd_size), jnp.float32) * 0.1

    out = multi_head_attention(x, wq, wk, wv, wp, bp)
    out = jax.block_until_ready(out)

    ref = _reference(x, wq, wk, wv, wp, bp)
    assert out.shape == (B, T, embd_size)
    # Tolerance accounts for bf16 MXU operands (f32 accumulation everywhere)
    # and the approximate EUP reciprocal used for the softmax denominator.
    assert jnp.allclose(out, ref, atol=3e-2, rtol=3e-2), "mismatch vs reference"

    print("KERNEL_OK")
</pallas_src>

<mosaic_0001>
module attributes {stable_mosaic.version = 11 : i64} {
  func.func @_qkv_proj_kernel(%arg0: i32, %arg1: memref<16x32xf32, #tpu.memory_space<vmem>>, %arg2: memref<32x96xbf16, #tpu.memory_space<vmem>>, %arg3: memref<16x32xbf16, #tpu.memory_space<vmem>>, %arg4: memref<16x32xbf16, #tpu.memory_space<vmem>>, %arg5: memref<16x32xbf16, #tpu.memory_space<vmem>>) attributes {dimension_semantics = [#tpu.dimension_semantics<parallel>], iteration_bounds = array<i64: 1>, scalar_prefetch = 0 : i64, scratch_operands = 0 : i64, tpu.core_type = #tpu.core_type<tc>, window_params = [{transform_indices = @transform_0, window_bounds = array<i64: 16, 32>}, {pipeline_mode = #tpu.pipeline_mode<synchronous>, transform_indices = @transform_1, window_bounds = array<i64: 32, 96>}, {transform_indices = @transform_2, window_bounds = array<i64: 16, 32>}, {transform_indices = @transform_3, window_bounds = array<i64: 16, 32>}, {transform_indices = @transform_4, window_bounds = array<i64: 16, 32>}]} {
    %c0 = arith.constant 0 : index
    %c0_0 = arith.constant 0 : index
    %0 = vector.load %arg1[%c0, %c0_0] : memref<16x32xf32, #tpu.memory_space<vmem>>, vector<16x32xf32>
    %1 = arith.truncf %0 : vector<16x32xf32> to vector<16x32xbf16>
    %c0_1 = arith.constant 0 : index
    %c0_2 = arith.constant 0 : index
    %2 = vector.load %arg2[%c0_1, %c0_2] : memref<32x96xbf16, #tpu.memory_space<vmem>>, vector<32x96xbf16>
    %cst = arith.constant dense<0.000000e+00> : vector<16x96xf32>
    %3 = tpu.matmul %1, %2, %cst {dimension_numbers = #tpu.dot_dimension_numbers<[1], [0], [0], [1], [0, 0, 1, 1], [], []>} : vector<16x32xbf16>, vector<32x96xbf16>, vector<16x96xf32> -> vector<16x96xf32>
    %4 = vector.extract_strided_slice %3 {offsets = [0, 0], sizes = [16, 32], strides = [1, 1]} : vector<16x96xf32> to vector<16x32xf32>
    %5 = arith.truncf %4 : vector<16x32xf32> to vector<16x32xbf16>
    %c0_3 = arith.constant 0 : index
    %c0_4 = arith.constant 0 : index
    %6 = vector.load %arg3[%c0_3, %c0_4] : memref<16x32xbf16, #tpu.memory_space<vmem>>, vector<16x32xbf16>
    tpu.vector_store %arg3[%c0_3, %c0_4], %5 {strides = array<i32>} : memref<16x32xbf16, #tpu.memory_space<vmem>>, vector<16x32xbf16>,
    %7 = vector.extract_strided_slice %3 {offsets = [0, 32], sizes = [16, 32], strides = [1, 1]} : vector<16x96xf32> to vector<16x32xf32>
    %8 = arith.truncf %7 : vector<16x32xf32> to vector<16x32xbf16>
    %c0_5 = arith.constant 0 : index
    %c0_6 = arith.constant 0 : index
    %9 = vector.load %arg4[%c0_5, %c0_6] : memref<16x32xbf16, #tpu.memory_space<vmem>>, vector<16x32xbf16>
    tpu.vector_store %arg4[%c0_5, %c0_6], %8 {strides = array<i32>} : memref<16x32xbf16, #tpu.memory_space<vmem>>, vector<16x32xbf16>,
    %10 = vector.extract_strided_slice %3 {offsets = [0, 64], sizes = [16, 32], strides = [1, 1]} : vector<16x96xf32> to vector<16x32xf32>
    %11 = arith.truncf %10 : vector<16x32xf32> to vector<16x32xbf16>
    %c0_7 = arith.constant 0 : index
    %c0_8 = arith.constant 0 : index
    %12 = vector.load %arg5[%c0_7, %c0_8] : memref<16x32xbf16, #tpu.memory_space<vmem>>, vector<16x32xbf16>
    tpu.vector_store %arg5[%c0_7, %c0_8], %11 {strides = array<i32>} : memref<16x32xbf16, #tpu.memory_space<vmem>>, vector<16x32xbf16>,
    return
  }
  func.func @transform_0(%arg0: i32) -> (i32, i32) {
    %c0_i32 = arith.constant 0 : i32
    %c0_i32_0 = arith.constant 0 : i32
    return %arg0, %c0_i32 : i32, i32
  }
  func.func @transform_1(%arg0: i32) -> (i32, i32) {
    %c0_i32 = arith.constant 0 : i32
    %c0_i32_0 = arith.constant 0 : i32
    %c0_i32_1 = arith.constant 0 : i32
    return %c0_i32, %c0_i32_0 : i32, i32
  }
  func.func @transform_2(%arg0: i32) -> (i32, i32) {
    %c0_i32 = arith.constant 0 : i32
    %c0_i32_0 = arith.constant 0 : i32
    return %arg0, %c0_i32 : i32, i32
  }
  func.func @transform_3(%arg0: i32) -> (i32, i32) {
    %c0_i32 = arith.constant 0 : i32
    %c0_i32_0 = arith.constant 0 : i32
    return %arg0, %c0_i32 : i32, i32
  }
  func.func @transform_4(%arg0: i32) -> (i32, i32) {
    %c0_i32 = arith.constant 0 : i32
    %c0_i32_0 = arith.constant 0 : i32
    return %arg0, %c0_i32 : i32, i32
  }
}

</mosaic_0001>

<bundles_post_ra>
// kernel: tpu_custom_call.1
= control target key start
LH: loop header
LB: loop body
LE: loop exit
PB: predicated region body
PF: predicated region fallthrough
CT: control target
= control target key end

     0   :  { %10 = vsyncpa [#allocation3], 0  ;;  %s459_s0 = inlined_call_operand.hbm [shape: f32[16,32], index: 0, kind: input, shape index: {}]   ;;  %s460_s1 = inlined_call_operand.hbm [shape: bf16[32,96], index: 1, kind: input, shape index: {}]   ;;  %s461_s2 = inlined_call_operand.hbm [shape: bf16[16,32], index: 2, kind: output, shape index: {0}]   ;;  %s462_s3 = inlined_call_operand.hbm [shape: bf16[16,32], index: 3, kind: output, shape index: {1}]   ;;  %s463_s4 = inlined_call_operand.hbm [shape: bf16[16,32], index: 4, kind: output, shape index: {2}]  }
   0x1   :  { %11 = vsyncpa [#allocation6], 0 }
   0x2   :  { %12 = vsyncpa [#allocation4], 0 }
   0x3   :  { %13 = vsyncpa [#allocation9], 0  ;;  %s335_s15 = smov [#allocation2]   ;;  %s217_s19 = scalar_lea.hbm %s459_s0, 256 }
   0x4   :  { %s19_s16 = sshll.u32 %s335_s15, 4  ;;  %p218_p0 = scmp.ne.s32.totalorder %s459_s0, %s217_s19  ;;  %s20_s16 = int_to_ptr.vmem [resolvable:$true] %s19_s16 }
   0x5   :  { %p221_p1 = scmp.lt.u32.totalorder %s217_s19, %s459_s0 }
   0x7   :  { %p223_p2 = pnand %p221_p1, %p218_p0 }
   0x9   :  { %226 = shalt.err (!%p223_p2)
}
   0xa   :  { %s227_s24 = scalar_lea.vmem %s20_s16, 256  ;;  %p232_p4 = scmp.lt.s32.totalorder %s20_s16, %s20_s16 }
   0xb   :  { %p228_p3 = scmp.ne.s32.totalorder %s20_s16, %s227_s24  ;;  %p233_p5 = scmp.lt.s32.totalorder %s227_s24, %s227_s24 }
   0xd   :  { %p234_p6 = por %p233_p5, %p232_p4 }
   0xf   :  { %p235_p7 = pnand %p234_p6, %p228_p3 }
  0x11   :  { %238 = shalt.err (!%p235_p7)
}
  0x12   :  { %s336_s25 = smov 128   ;;  %s337_s26 = smov 8  }
  0x13   :  { %25 = dma.hbm_to_vmem [thread:$0]  %s459_s0, 256, %s20_s16, [#allocation3], %s336_s25, %s336_s25, %s337_s26  }
  0x14   :  { %s338_s29 = smov [#allocation5]   ;;  %s239_s7 = scalar_lea.hbm %s460_s1, 256 }
  0x15   :  { %s31_s30 = sshll.u32 %s338_s29, 4  ;;  %p240_p8 = scmp.ne.s32.totalorder %s460_s1, %s239_s7  ;;  %s32_s30 = int_to_ptr.vmem [resolvable:$true] %s31_s30 }
  0x16   :  { %p243_p9 = scmp.lt.u32.totalorder %s239_s7, %s460_s1 }
  0x18   :  { %p245_p10 = pnand %p243_p9, %p240_p8 }
  0x1a   :  { %248 = shalt.err (!%p245_p10)
}
  0x1b   :  { %s249_s12 = scalar_lea.vmem %s32_s30, 256  ;;  %p254_p12 = scmp.lt.s32.totalorder %s32_s30, %s32_s30 }
  0x1c   :  { %p250_p11 = scmp.ne.s32.totalorder %s32_s30, %s249_s12  ;;  %p255_p13 = scmp.lt.s32.totalorder %s249_s12, %s249_s12 }
  0x1e   :  { %p256_p0 = por %p255_p13, %p254_p12 }
  0x20   :  { %p257_p1 = pnand %p256_p0, %p250_p11 }
  0x22   :  { %260 = shalt.err (!%p257_p1)
}
  0x23   :  { %s339_s0 = smov 64   ;;  %s340_s13 = smov 4  }
  0x24   :  { %37 = dma.hbm_to_vmem [thread:$0]  %s460_s1, 256, %s32_s30, [#allocation6], %s339_s0, %s339_s0, %s340_s13  }
  0x25   :  { %327 = dma.done.wait [#allocation3], 256  }
  0x26   :  { %328 = vsyncadd [#allocation3], 4294967040 }
  0x27   :  { %329 = dma.done.wait [#allocation6], 256  }
  0x28   :  { %330 = vsyncadd [#allocation6], 4294967040  ;;  %v341_v0 = vmov 0.0   ;;  %vm342_vm0 = vmmov 0   ;;  %v215_v1 = vld [vmem:[#allocation5] sm:$0xff]   ;;  %v216_v2 = vld [vmem:[#allocation5 + $0x8] sm:$0xff]  }
  0x29   :  { %195 = vmatprep.subr.bf16.mxu0 %v341_v0  ;;  %199 = vmatprep.mubr.msk.bf16.mxu0 %vm342_vm0, %v341_v0  ;;  %v45_v3 = vld [vmem:[#allocation2] sm:$0xff]  ;;  %v46_v4 = vld [vmem:[#allocation2 + $0x8] sm:$0xff]  ;;  %vm64_vm1 = vcmask 261120   ;;  %vm117_vm2 = vcmask 257024   ;;  %s343_s1 = smov [#allocation7]   ;;  %s344_s17 = smov 96  }
  0x2a   :  { %196 = vmatpush3.bf16.msra.mxu0 %v215_v1  ;;  %v47_v5 = vpack.c.bf16 %v46_v4, %v45_v3  ;;  %s141_s16 = sshll.u32 %s343_s1, 4  ;;  %s142_s16 = int_to_ptr.vmem [resolvable:$true] %s141_s16 }
  0x2b   :  { %197 = vmatprep.subr.bf16.mxu0 %v341_v0  ;;  %s261_s18 = scalar_lea.vmem %s142_s16, 128  ;;  %p266_p3 = scmp.lt.s32.totalorder %s142_s16, %s142_s16 }
  0x2c   :  { %p262_p2 = scmp.ne.s32.totalorder %s142_s16, %s261_s18  ;;  %p267_p4 = scmp.lt.s32.totalorder %s261_s18, %s261_s18 }
  0x2e   :  { %198 = vmatpush3.bf16.msra.mxu0 %v216_v2  ;;  %p268_p5 = por %p267_p4, %p266_p3 }
  0x30   :  { %p269_p6 = pnand %p268_p5, %p262_p2 }
  0x31   :  { %200 = vmatmul.mubr.msk.bf16.vlgmr.msra.gmra.mrb[0].mxu0 %vm64_vm1, %v47_v5 }
 0x104   :  { %v102_v6 = vpop.f32.mrb[0].mxu0 }
 0x105   :  { %v190_v7 = vpack.c.bf16 %v102_v6, %v102_v6  ;;  %v201_v8 = vpop.f32.mrb[1].mxu0 }
 0x106   :  { %v105_v9 = vpop.f32.mrb[2].mxu0 }
 0x107   :  { %v191_v10 = vpack.c.bf16 %v105_v9, %v105_v9  ;;  %128 = vrot.lane.b32.xlu1 %v190_v7, %s339_s0  ;;  %120 = vrot.lane.b32.xlu0 %v190_v7, %s344_s17  ;;  %v202_v11 = vpop.f32.mrb[3].mxu0  ;;  %118 = vst.msk [vmem:[#allocation7] sm:$0xf] %vm117_vm2, %v190_v7 }
 0x109   :  { %119 = vst.msk [vmem:[#allocation7 + $0x4] sm:$0xf] %vm117_vm2, %v191_v10 }
 0x10a   :  { %272 = shalt.err (!%p269_p6)
}
 0x10b   :  { %s273_s21 = scalar_lea.hbm %s461_s2, 128 }
 0x10c   :  { %p274_p7 = scmp.ne.s32.totalorder %s461_s2, %s273_s21  ;;  %p277_p8 = scmp.lt.u32.totalorder %s273_s21, %s461_s2 }
 0x10e   :  { %p279_p9 = pnand %p277_p8, %p274_p7 }
 0x110   :  { %282 = shalt.err (!%p279_p9)
}
 0x111   :  { %147 = dma.vmem_to_hbm [thread:$0]  %s142_s16, 128, %s461_s2, [#allocation4], %s339_s0, %s339_s0, %s340_s13  }
 0x112   :  { %130 = vrot.lane.b32.xlu1 %v191_v10, %s339_s0  ;;  %122 = vrot.lane.b32.xlu0 %v191_v10, %s344_s17  ;;  %s345_s28 = smov [#allocation8]   ;;  %s346_s30 = smov [#allocation10]  }
 0x113   :  { %s153_s29 = sshll.u32 %s345_s28, 4  ;;  %s165_s5 = sshll.u32 %s346_s30, 4  ;;  %s154_s29 = int_to_ptr.vmem [resolvable:$true] %s153_s29  ;;  %s420_s5 = int_to_ptr.vmem [resolvable:$true] %s165_s5 }
 0x114   :  { %s283_s2 = scalar_lea.vmem %s154_s29, 128  ;;  %p288_p11 = scmp.lt.s32.totalorder %s154_s29, %s154_s29 }
 0x115   :  { %p284_p10 = scmp.ne.s32.totalorder %s154_s29, %s283_s2  ;;  %p289_p12 = scmp.lt.s32.totalorder %s283_s2, %s283_s2 }
 0x117   :  { %p290_p13 = por %p289_p12, %p288_p11 }
 0x119   :  { %p291_p0 = pnand %p290_p13, %p284_p10 }
 0x179   :  { %v129_v12 = vpop.permute.xlu1 %128  ;;  %v121_v13 = vpop.permute.xlu0 %120 }
 0x17a   :  { %134 = vst.msk [vmem:[#allocation10] sm:$0xf] %vm117_vm2, %v129_v12  ;;  %126 = vst.msk [vmem:[#allocation8] sm:$0xf] %vm117_vm2, %v121_v13 }
 0x184   :  { %v131_v14 = vpop.permute.xlu1 %130  ;;  %v123_v15 = vpop.permute.xlu0 %122 }
 0x185   :  { %135 = vst.msk [vmem:[#allocation10 + $0x4] sm:$0xf] %vm117_vm2, %v131_v14  ;;  %127 = vst.msk [vmem:[#allocation8 + $0x4] sm:$0xf] %vm117_vm2, %v123_v15 }
 0x186   :  { %294 = shalt.err (!%p291_p0)
}
 0x187   :  { %s295_s8 = scalar_lea.hbm %s462_s3, 128 }
 0x188   :  { %p296_p1 = scmp.ne.s32.totalorder %s462_s3, %s295_s8  ;;  %p299_p2 = scmp.lt.u32.totalorder %s295_s8, %s462_s3 }
 0x18a   :  { %p301_p3 = pnand %p299_p2, %p296_p1 }
 0x18c   :  { %304 = shalt.err (!%p301_p3)
}
 0x18d   :  { %159 = dma.vmem_to_hbm [thread:$0]  %s154_s29, 128, %s462_s3, [#allocation9], %s339_s0, %s339_s0, %s340_s13  }
 0x18e   :  { %s305_s1 = scalar_lea.vmem %s420_s5, 128  ;;  %p310_p5 = scmp.lt.s32.totalorder %s420_s5, %s420_s5 }
 0x18f   :  { %p306_p4 = scmp.ne.s32.totalorder %s420_s5, %s305_s1  ;;  %p311_p6 = scmp.lt.s32.totalorder %s305_s1, %s305_s1 }
 0x191   :  { %p312_p7 = por %p311_p6, %p310_p5 }
 0x193   :  { %p313_p8 = pnand %p312_p7, %p306_p4 }
 0x195   :  { %316 = shalt.err (!%p313_p8)
}
 0x196   :  { %s317_s18 = scalar_lea.hbm %s463_s4, 128 }
 0x197   :  { %p318_p9 = scmp.ne.s32.totalorder %s463_s4, %s317_s18  ;;  %p321_p10 = scmp.lt.u32.totalorder %s317_s18, %s463_s4 }
 0x199   :  { %p323_p11 = pnand %p321_p10, %p318_p9 }
 0x19b   :  { %326 = shalt.err (!%p323_p11)
}
 0x19c   :  { %171 = dma.vmem_to_hbm [thread:$0]  %s420_s5, 128, %s463_s4, [#allocation9], %s339_s0, %s339_s0, %s340_s13  }
 0x19d   :  { %331 = dma.done.wait [#allocation4], 128  }
 0x19e   :  { %332 = vsyncadd [#allocation4], 4294967168 }
 0x19f   :  { %333 = dma.done.wait [#allocation9], 256  }
 0x1a0   :  { %334 = vsyncadd [#allocation9], 4294967040 }
 0x1a1   :  { %181 = vsyncpa [#allocation3], 1 }
 0x1a2   :  { %182 = vsyncpa [#allocation6], 1 }
 0x1a3   :  { %183 = vsyncpa [#allocation4], 1 }
 0x1a4   :  { %184 = vsyncpa [#allocation9], 1 }

</bundles_post_ra>
